<compile_context>
chip_gen: v5e
topology: v5e:2x2
jax: 0.10.0
libtpu: 0.0.40
codegen_flags: <defaults>
</compile_context>

<pallas_src>
import functools
import math

import jax
import jax.numpy as jnp
from jax.experimental import pallas as pl
from jax.experimental.pallas import tpu as pltpu


# ---------------------------------------------------------------------------
# Kernel: one block of `block_n` independent linears per grid step.
#   x_ref : (block_n, B, in_d)      compute dtype (f32 or bf16)
#   w_ref : (block_n, in_d, out_d)  compute dtype
#   b_ref : (block_n, 1, out_d)     f32  (== bias[:, 0, :], the only row used)
#   o_ref : (block_n, B, out_d)     output dtype
# ---------------------------------------------------------------------------
def independent_linears_kernel(x_ref, w_ref, b_ref, o_ref, *, init):
    # Batched matmul over the linear index (batch dim 0): a single MXU-friendly
    # op for the whole block — no per-index slicing / concatenate.
    y = jax.lax.dot_general(
        x_ref[...], w_ref[...],
        dimension_numbers=(((2,), (1,)), ((0,), (0,))),
        preferred_element_type=jnp.float32,
    )                                    # (block_n, B, out_d) f32 accumulation
    y = y + b_ref[...]                   # bias broadcasts over B, in f32
    # `init` is a static Python scalar, exactly like the module's self.init.
    # TODO(synk): a traced/array `init` would need an SMEM scalar input instead.
    if init != 0:
        y = y + jnp.float32(init)
    o_ref[...] = y.astype(o_ref.dtype)


def _pick_block_n(n, per_linear_bytes, vmem_budget_bytes=8 * 1024 * 1024):
    """Largest divisor of n that fits the VMEM budget and leaves >=2 grid steps."""
    cap = max(1, min(n, vmem_budget_bytes // max(per_linear_bytes, 1)))
    if n >= 2:
        cap = min(cap, max(1, n // 2))   # expose >=2 grid points (v7x megacore)
    for c in range(cap, 0, -1):
        if n % c == 0:
            return c
    return 1


def independent_linears(x, weight, bias, *, init=0.0, transpose=False,
                        compute_dtype=None, block_n=None):
    """Pallas implementation of IndependentLinears.forward."""
    out_dtype = x.dtype
    if compute_dtype is None:
        compute_dtype = x.dtype

    if transpose:
        x = jnp.swapaxes(x, 1, 2)                               # -> (B, in_d, n)
    B, in_d, n = x.shape
    n_w, in_d_w, out_d = weight.shape
    assert (n_w, in_d_w) == (n, in_d), (weight.shape, x.shape)

    # Layout plumbing (wrapper-side): linear index -> leading axis, feature dim
    # -> lane axis, so every kernel tile is lane-dense.
    xt = jnp.transpose(x, (2, 0, 1)).astype(compute_dtype)      # (n, B, in_d)
    w = weight.astype(compute_dtype)                            # (n, in_d, out_d)
    # Only bias[:, 0, :] is used by the PyTorch module.
    b0 = bias[:, 0, :].astype(jnp.float32).reshape(n, 1, out_d)  # (n, 1, out_d)

    comp_bytes = jnp.dtype(compute_dtype).itemsize
    out_bytes = jnp.dtype(out_dtype).itemsize
    per_linear_bytes = (B * in_d * comp_bytes + in_d * out_d * comp_bytes
                        + out_d * 4 + B * out_d * out_bytes)
    if block_n is None:
        block_n = _pick_block_n(n, per_linear_bytes)
    assert n % block_n == 0, (n, block_n)
    grid = (n // block_n,)

    # Explicit scoped-VMEM limit sized from the real (double-buffered) footprint.
    needed = 2 * block_n * per_linear_bytes
    vmem_limit = int(min(64 * 1024 * 1024, max(32 * 1024 * 1024, 4 * needed)))

    kernel = functools.partial(independent_linears_kernel, init=init)

    out_t = pl.pallas_call(
        kernel,
        out_shape=jax.ShapeDtypeStruct((n, B, out_d), out_dtype),
        grid_spec=pltpu.PrefetchScalarGridSpec(
            num_scalar_prefetch=0,
            grid=grid,
            in_specs=[
                pl.BlockSpec((block_n, B, in_d), lambda i: (i, 0, 0)),
                pl.BlockSpec((block_n, in_d, out_d), lambda i: (i, 0, 0)),
                pl.BlockSpec((block_n, 1, out_d), lambda i: (i, 0, 0)),
            ],
            out_specs=pl.BlockSpec((block_n, B, out_d), lambda i: (i, 0, 0)),
        ),
        compiler_params=pltpu.CompilerParams(
            dimension_semantics=("parallel",),
            vmem_limit_bytes=vmem_limit,
        ),
    )(xt, w, b0)

    out = jnp.transpose(out_t, (1, 2, 0))                       # (B, out_d, n)
    if transpose:
        out = jnp.swapaxes(out, 1, 2)                           # (B, n, out_d)
    return out


# ---------------------------------------------------------------------------
# Pure-JAX reference mirroring the PyTorch forward op-for-op.
# ---------------------------------------------------------------------------
def independent_linears_reference(x, weight, bias, *, init=0.0, transpose=False):
    if transpose:
        x = jnp.swapaxes(x, 1, 2)
    xt = jnp.swapaxes(x, 1, 2)[:, :, None, :]                   # (B, n, 1, in_d)
    y = jnp.matmul(xt, weight[None],
                   precision=jax.lax.Precision.HIGHEST) + bias[None]
    y = y[:, :, 0, :]                                            # (B, n, out_d)
    y = jnp.swapaxes(y, 1, 2)                                    # (B, out_d, n)
    y = y + init
    if transpose:
        y = jnp.swapaxes(y, 1, 2)
    return y


if __name__ == "__main__":
    B, in_d, out_d, n = 2, 32, 32, 16
    init = 0.1

    key = jax.random.PRNGKey(0)
    kx, kw, kb = jax.random.split(key, 3)
    x = jax.random.normal(kx, (B, in_d, n), jnp.float32)
    # zero_init=True would make the test trivially zero; use non-zero params so
    # the numerical check is meaningful (same shapes as the nn.Parameters).
    weight = jax.random.normal(kw, (n, in_d, out_d), jnp.float32) / math.sqrt(in_d)
    bias = 0.02 * jax.random.normal(kb, (n, in_d, out_d), jnp.float32)

    ref = independent_linears_reference(x, weight, bias, init=init)

    # f32 path — tight check.
    out = independent_linears(x, weight, bias, init=init,
                              compute_dtype=jnp.float32)
    out = jax.block_until_ready(out)
    assert out.shape == (B, out_d, n)
    assert jnp.allclose(out, ref, atol=1e-4, rtol=1e-4), (
        float(jnp.max(jnp.abs(out - ref))))

    # bf16 MXU-input path (perf config: halves HBM weight traffic, f32 accum).
    out_bf16 = jax.block_until_ready(
        independent_linears(x, weight, bias, init=init,
                            compute_dtype=jnp.bfloat16))
    assert jnp.allclose(out_bf16, ref, atol=1e-1, rtol=1e-1), (
        float(jnp.max(jnp.abs(out_bf16 - ref))))

    # transpose=True path.
    x_t = jnp.swapaxes(x, 1, 2)                                  # (B, n, in_d)
    out_tr = jax.block_until_ready(
        independent_linears(x_t, weight, bias, init=init, transpose=True,
                            compute_dtype=jnp.float32))
    ref_tr = independent_linears_reference(x_t, weight, bias, init=init,
                                           transpose=True)
    assert out_tr.shape == (B, n, out_d)
    assert jnp.allclose(out_tr, ref_tr, atol=1e-4, rtol=1e-4), (
        float(jnp.max(jnp.abs(out_tr - ref_tr))))

    print("KERNEL_OK")
</pallas_src>

<mosaic_0001>
module attributes {stable_mosaic.version = 11 : i64} {
  func.func @independent_linears_kernel(%arg0: i32, %arg1: memref<8x2x32xf32, #tpu.memory_space<vmem>>, %arg2: memref<8x32x32xf32, #tpu.memory_space<vmem>>, %arg3: memref<8x1x32xf32, #tpu.memory_space<vmem>>, %arg4: memref<8x2x32xf32, #tpu.memory_space<vmem>>) attributes {dimension_semantics = [#tpu.dimension_semantics<parallel>], iteration_bounds = array<i64: 2>, scalar_prefetch = 0 : i64, scratch_operands = 0 : i64, tpu.core_type = #tpu.core_type<tc>, window_params = [{transform_indices = @transform_0, window_bounds = array<i64: 8, 2, 32>}, {transform_indices = @transform_1, window_bounds = array<i64: 8, 32, 32>}, {transform_indices = @transform_2, window_bounds = array<i64: 8, 1, 32>}, {transform_indices = @transform_3, window_bounds = array<i64: 8, 2, 32>}]} {
    %c0 = arith.constant 0 : index
    %c0_0 = arith.constant 0 : index
    %c0_1 = arith.constant 0 : index
    %0 = vector.load %arg1[%c0, %c0_0, %c0_1] : memref<8x2x32xf32, #tpu.memory_space<vmem>>, vector<8x2x32xf32>
    %c0_2 = arith.constant 0 : index
    %c0_3 = arith.constant 0 : index
    %c0_4 = arith.constant 0 : index
    %1 = vector.load %arg2[%c0_2, %c0_3, %c0_4] : memref<8x32x32xf32, #tpu.memory_space<vmem>>, vector<8x32x32xf32>
    %cst = arith.constant dense<0.000000e+00> : vector<8x2x32xf32>
    %2 = tpu.matmul %0, %1, %cst {dimension_numbers = #tpu.dot_dimension_numbers<[2], [1], [1], [2], [0, 0, 0, 1, 1, 2], [0], [0]>} : vector<8x2x32xf32>, vector<8x32x32xf32>, vector<8x2x32xf32> -> vector<8x2x32xf32>
    %c0_5 = arith.constant 0 : index
    %c0_6 = arith.constant 0 : index
    %c0_7 = arith.constant 0 : index
    %3 = vector.load %arg3[%c0_5, %c0_6, %c0_7] : memref<8x1x32xf32, #tpu.memory_space<vmem>>, vector<8x1x32xf32>
    %4 = vector.broadcast %3 : vector<8x1x32xf32> to vector<8x2x32xf32>
    %5 = arith.addf %2, %4 : vector<8x2x32xf32>
    %cst_8 = arith.constant 1.000000e-01 : f32
    %6 = vector.broadcast %cst_8 : f32 to vector<8x2x32xf32>
    %7 = arith.addf %5, %6 : vector<8x2x32xf32>
    %c0_9 = arith.constant 0 : index
    %c0_10 = arith.constant 0 : index
    %c0_11 = arith.constant 0 : index
    %8 = vector.load %arg4[%c0_9, %c0_10, %c0_11] : memref<8x2x32xf32, #tpu.memory_space<vmem>>, vector<8x2x32xf32>
    tpu.vector_store %arg4[%c0_9, %c0_10, %c0_11], %7 {strides = array<i32>} : memref<8x2x32xf32, #tpu.memory_space<vmem>>, vector<8x2x32xf32>,
    return
  }
  func.func @transform_0(%arg0: i32) -> (i32, i32, i32) {
    %c0_i32 = arith.constant 0 : i32
    %c0_i32_0 = arith.constant 0 : i32
    %c0_i32_1 = arith.constant 0 : i32
    return %arg0, %c0_i32, %c0_i32_0 : i32, i32, i32
  }
  func.func @transform_1(%arg0: i32) -> (i32, i32, i32) {
    %c0_i32 = arith.constant 0 : i32
    %c0_i32_0 = arith.constant 0 : i32
    %c0_i32_1 = arith.constant 0 : i32
    return %arg0, %c0_i32, %c0_i32_0 : i32, i32, i32
  }
  func.func @transform_2(%arg0: i32) -> (i32, i32, i32) {
    %c0_i32 = arith.constant 0 : i32
    %c0_i32_0 = arith.constant 0 : i32
    %c0_i32_1 = arith.constant 0 : i32
    return %arg0, %c0_i32, %c0_i32_0 : i32, i32, i32
  }
  func.func @transform_3(%arg0: i32) -> (i32, i32, i32) {
    %c0_i32 = arith.constant 0 : i32
    %c0_i32_0 = arith.constant 0 : i32
    %c0_i32_1 = arith.constant 0 : i32
    return %arg0, %c0_i32, %c0_i32_0 : i32, i32, i32
  }
}

</mosaic_0001>

<bundles_post_ra>
// kernel: tpu_custom_call.1
= control target key start
LH: loop header
LB: loop body
LE: loop exit
PB: predicated region body
PF: predicated region fallthrough
CT: control target
= control target key end

     0   :  { %s1228_s0 = inlined_call_operand.hbm [shape: f32[16,2,32], index: 0, kind: input, shape index: {}]   ;;  %s1229_s1 = inlined_call_operand.hbm [shape: f32[16,32,32], index: 1, kind: input, shape index: {}]   ;;  %s1230_s2 = inlined_call_operand.hbm [shape: f32[16,1,32], index: 2, kind: input, shape index: {}]   ;;  %s1231_s3 = inlined_call_operand.hbm [shape: f32[16,2,32], index: 3, kind: output, shape index: {}]  }
   0x1   :  { %1233 = sst [smem:[#allocation14_spill]] %s1229_s1 }
   0x2   :  { %8 = vsyncpa [#allocation3], 0 }
   0x3   :  { %10 = vsyncpa [#allocation3 + $0x1], 0 }
   0x4   :  { %11 = vsyncpa [#allocation6], 0 }
   0x5   :  { %13 = vsyncpa [#allocation6 + $0x1], 0 }
   0x6   :  { %14 = vsyncpa [#allocation4], 0 }
   0x7   :  { %16 = vsyncpa [#allocation4 + $0x1], 0  ;;  %s978_s12 = smov 0   ;;  %s980_s13 = smov 0  }
   0x8   :  { %s982_s14 = smov 0   ;;  %s984_s15 = smov 0  }
   0x9 LB: > { %1234 = sst [smem:[#allocation12_spill]] %s944_s14  ;;  %s999_s16 = sadd.s32 4294967295, %s948_s15   ;;  %s948_s15 = sphi %s984_s15, %s1246_s15   ;;  %s944_s14 = sphi %s982_s14, %s1243_s14   ;;  %s940_s13 = sphi %s980_s13, %s1245_s13   ;;  %s936_s12 = sphi %s978_s12, %s1244_s12  }
   0xa   : > { %s682_s17 = sadd.s32 4294967294, %s948_s15   ;;  %s1003_s18 = sadd.s32 1, %s948_s15  }
   0xb   : > { %s29_s19 = sadd.s32 1, %s944_s14  ;;  %s26_s20 = ssub.s32 %s948_s15, %s1003_s18 }
   0xc   : > { %p36_p0 = scmp.ne.s32.totalorder %s944_s14, %s940_s13  ;;  %p27_p1 = scmp.eq.s32.totalorder %s26_s20, 0 }
   0xd   : > { %p37_p2 = scmp.eq.s32.totalorder %s948_s15, 0  ;;  %p42_p3 = scmp.ne.s32.totalorder %s940_s13, %s936_s12 }
   0xe   : > { %p43_p4 = scmp.eq.s32.totalorder %s999_s16, 0  ;;  %p118_p7 = scmp.eq.s32.totalorder %s999_s16, 1 }
   0xf   : > { %s1015_s21 = scalar_select %p27_p1, %s944_s14, %s29_s19  }
  0x10   : > { %p38_p5 = por %p37_p2, %p36_p0  ;;  %p1017_p6 = por %p43_p4, %p42_p3 }
  0x11   : > { %1235 = sst [smem:[#allocation13_spill]] %s1015_s21  ;;  %p124_p8 = scmp.eq.s32.totalorder %s682_s17, 1 }
  0x12   : > { %p684_p9 = scmp.ge.s32.totalorder %s948_s15, 2  ;;  %p738_p10 = scmp.lt.s32.totalorder %s948_s15, 2 }
  0x13   : > { %p1024_p11 = por %p118_p7, %p36_p0  ;;  %p1028_p12 = por %p124_p8, %p42_p3 }
  0x14   : > { %s1033_s25 = sand.u32 1, %s944_s14   ;;  %p1035_p13 = pnand %p738_p10, %p38_p5 }
  0x15   : > { %s166_s27 = sand.u32 1, %s948_s15   ;;  %s688_s28 = sshll.u32 %s1033_s25, 8 }
  0x16   : > { %s714_s29 = sshll.u32 %s948_s15, 8  ;;  %s1240_s1 = sld [smem:[#allocation14_spill]] }
  0x17   : > { %s170_s6 = scalar_lea.vmem [#allocation5], %s688_s28  ;;  %p694_p0 = scmp.ge.s32.totalorder %s948_s15, 1 }
  0x18   : > { %s179_s7 = sshll.u32 %s170_s6, 4  ;;  %s1046_s9 = scalar_lea.sflag [#allocation6], %s166_s27  ;;  %s180_s7 = int_to_ptr.vmem [resolvable:$true] %s179_s7 }
  0x19   : > { %p792_p2 = pneg %p1035_p13 }
  0x1c   : > { %s176_s5 = scalar_lea.hbm %s1240_s1, %s714_s29  ;;  %s795_s20 = scalar_lea.hbm %s1240_s1, 512 }
  0x1d   : > { %s177_s8 = sshll.u32 %s176_s5, 4  ;;  %s178_s8 = int_to_ptr.hbm [resolvable:$true] %s177_s8 }
  0x1e   : > { %s788_s10 = sshra.s32 %s178_s8, 4  ;;  %s789_s10 = int_to_ptr.hbm [resolvable:$true] %s788_s10 }
  0x1f   : > { %s790_s11 = scalar_lea.hbm %s789_s10, 256  ;;  %p796_p5 = scmp.lt.s32.totalorder %s789_s10, %s1240_s1 }
  0x20   : > { %p791_p1 = scmp.ne.s32.totalorder %s789_s10, %s790_s11  ;;  %p797_p7 = scmp.lt.s32.totalorder %s795_s20, %s790_s11 }
  0x22   : > { %p793_p3 = pnand %p792_p2, %p791_p1  ;;  %p798_p8 = por %p797_p7, %p796_p5 }
  0x24   : > { %p794_p4 = pneg %p793_p3 }
  0x26   : > { %p799_p10 = pnand %p798_p8, %p794_p4 }
  0x28   : > { %802 = shalt.err (!%p799_p10)
}
  0x29   : > { %s950_s27 = smov 128   ;;  %s951_s30 = smov 8  }
  0x2a   : > { %730 = dma.hbm_to_vmem [thread:$0]  (!%p1035_p13), %s178_s8, 4096, %s180_s7, %s1046_s9, %s950_s27, %s950_s27, %s951_s30  }
  0x2b   : > { %p208_p1 = scmp.lt.s32.totalorder %s948_s15, 3  ;;  %s685_s4 = sshll.u32 %s1033_s25, 4 }
  0x2c   : > { %s712_s5 = sshll.u32 %s948_s15, 4  ;;  %s148_s19 = scalar_lea.vmem [#allocation2], %s685_s4 }
  0x2d   : > { %p1067_p3 = pnand %p694_p0, %p208_p1  ;;  %s153_s17 = scalar_lea.hbm %s1228_s0, %s712_s5 }
  0x2e   : > { %s156_s20 = sshll.u32 %s148_s19, 4  ;;  %s154_s28 = sshll.u32 %s153_s17, 4  ;;  %s157_s20 = int_to_ptr.vmem [resolvable:$true] %s156_s20  ;;  %s155_s28 = int_to_ptr.hbm [resolvable:$true] %s154_s28 }
  0x2f   : > { %s692_s29 = sshll.u32 %s1033_s25, 3  ;;  %s145_s7 = scalar_lea.sflag [#allocation3], %s1033_s25 }
  0x30   : > { %s818_s8 = sshra.s32 %s155_s28, 4  ;;  %s825_s10 = scalar_lea.hbm %s1228_s0, 32  ;;  %s819_s8 = int_to_ptr.hbm [resolvable:$true] %s818_s8 }
  0x31   : > { %s820_s27 = scalar_lea.hbm %s819_s8, 16  ;;  %p826_p7 = scmp.lt.s32.totalorder %s819_s8, %s1228_s0 }
  0x32   : > { %p821_p4 = scmp.ne.s32.totalorder %s819_s8, %s820_s27  ;;  %p827_p8 = scmp.lt.s32.totalorder %s825_s10, %s820_s27 }
  0x34   : > { %p823_p0 = pnand %p821_p4, %p792_p2  ;;  %p828_p10 = por %p827_p8, %p826_p7 }
  0x36   : > { %p824_p5 = pneg %p823_p0 }
  0x38   : > { %p829_p1 = pnand %p828_p10, %p824_p5 }
  0x3a   : > { %832 = shalt.err (!%p829_p1)
}
  0x3b   : > { %s952_s25 = smov 32   ;;  %s953_s11 = smov 2  }
  0x3c   : > { %727 = dma.hbm_to_vmem [thread:$0]  (!%p1035_p13), %s155_s28, 256, %s157_s20, %s145_s7, %s952_s25, %s952_s25, %s953_s11  }
  0x3d   : > { %s693_s17 = sshll.u32 %s948_s15, 3  ;;  %s193_s30 = scalar_lea.vmem [#allocation7], %s692_s29 }
  0x3e   : > { %s197_s1 = scalar_lea.hbm %s1230_s2, %s693_s17  ;;  %s200_s14 = sshll.u32 %s193_s30, 4  ;;  %s201_s14 = int_to_ptr.vmem [resolvable:$true] %s200_s14 }
  0x3f   : > { %s198_s5 = sshll.u32 %s197_s1, 4  ;;  %s855_s28 = scalar_lea.hbm %s1230_s2, 16  ;;  %s199_s5 = int_to_ptr.hbm [resolvable:$true] %s198_s5 }
  0x40   : > { %s848_s8 = sshra.s32 %s199_s5, 4  ;;  %s849_s8 = int_to_ptr.hbm [resolvable:$true] %s848_s8 }
  0x41   : > { %s850_s27 = scalar_lea.hbm %s849_s8, 8  ;;  %p856_p7 = scmp.lt.s32.totalorder %s849_s8, %s1230_s2 }
  0x42   : > { %p851_p4 = scmp.ne.s32.totalorder %s849_s8, %s850_s27  ;;  %p857_p8 = scmp.lt.s32.totalorder %s855_s28, %s850_s27 }
  0x44   : > { %p853_p0 = pnand %p851_p4, %p792_p2  ;;  %p858_p10 = por %p857_p8, %p856_p7 }
  0x46   : > { %p854_p5 = pneg %p853_p0 }
  0x48   : > { %p859_p1 = pnand %p858_p10, %p854_p5 }
  0x4a   : > { %862 = shalt.err (!%p859_p1)
}
  0x4b   : > { %s954_s29 = smov 16   ;;  %s955_s4 = smov 1  }
  0x4c   : > { %733 = dma.hbm_to_vmem [thread:$0]  (!%p1035_p13), %s199_s5, 128, %s201_s14, %s1046_s9, %s954_s29, %s954_s29, %s955_s4  }
  0x4d   : > { %212 = sbr.rel (%p1067_p3) target bundleno = 245 (0xf5), region = 32  ;;  %s1106_s25 = sand.u32 (!%p1067_p3), 1, %s940_s13  }
  0x4e   : > { %s695_s11 = sshll.u32 (!%p1067_p3), %s1106_s25, 4  ;;  %s215_s17 = scalar_lea.sflag (!%p1067_p3), [#allocation3], %s1106_s25 }
  0x4f   : > { %s1112_s19 = scalar_lea.vmem (!%p1067_p3), [#allocation2], %s695_s11 }
  0x52   : > { %923 = dma.done.wait (%p1017_p6), %s215_s17, 256  }
  0x53   : > { %925 = vsyncadd (%p1017_p6), %s215_s17, 4294967040  ;;  %s224_s14 = sand.u32 1, %s999_s16   ;;  %s696_s26 = sshll.u32 %s1106_s25, 8 }
  0x54   : > { %s225_s9 = scalar_lea.sflag [#allocation6], %s224_s14  ;;  %s1120_s6 = scalar_lea.vmem [#allocation5], %s696_s26 }
  0x55   : > { %927 = dma.done.wait (%p1017_p6), %s225_s9, 4224  }
  0x56   : > { %929 = vsyncadd (%p1017_p6), %s225_s9, 4294963072  ;;  %v295_v0 = vld [vmem:[%s1120_s6 + $0x58] sm:$0xff]  ;;  %v294_v2 = vld [vmem:[%s1120_s6 + $0x50] sm:$0xff]  ;;  %vm348_vm0 = vcmask 261120   ;;  %s697_s22 = sshll.u32 %s1106_s25, 3  ;;  %vm541_vm1 = vcmask 254976  }
  0x57   : > { %v299_v1 = vld [vmem:[%s1120_s6 + $0x78] sm:$0xff]  ;;  %410 = vmatpush.msra.mxu2 %v295_v0  ;;  %v298_v3 = vld [vmem:[%s1120_s6 + $0x70] sm:$0xff]  ;;  %v293_v4 = vld [vmem:[%s1120_s6 + $0x48] sm:$0xff]  ;;  %s1163_s1 = scalar_lea.vmem [#allocation7], %s697_s22  ;;  %s715_s30 = sshll.u32 %s999_s16, 4 }
  0x58   : > { %433 = vmatpush.msra.mxu3 %v299_v1  ;;  %v297_v5 = vld [vmem:[%s1120_s6 + $0x68] sm:$0xff]  ;;  %v287_v6 = vld [vmem:[%s1120_s6 + $0x18] sm:$0xff]  ;;  %v292_v8 = vld [vmem:[%s1120_s6 + $0x40] sm:$0xff]  ;;  %s271_s5 = scalar_lea.vmem [#allocation8], %s695_s11  ;;  %s562_s10 = scalar_lea.hbm %s1231_s3, %s715_s30 }
  0x59   : > { %v291_v7 = vld [vmem:[%s1120_s6 + $0x38] sm:$0xff]  ;;  %411 = vmatpush.msra.mxu2 %v294_v2  ;;  %364 = vmatpush.msra.mxu0 %v287_v6  ;;  %v296_v9 = vld [vmem:[%s1120_s6 + $0x60] sm:$0xff]  ;;  %v286_v10 = vld [vmem:[%s1120_s6 + $0x10] sm:$0xff]  ;;  %s563_s16 = sshll.u32 %s271_s5, 4  ;;  %s565_s20 = sshll.u32 %s562_s10, 4  ;;  %s564_s16 = int_to_ptr.vmem [resolvable:$true] %s563_s16  ;;  %s566_s20 = int_to_ptr.hbm [resolvable:$true] %s565_s20 }
  0x5a   : > { %434 = vmatpush.msra.mxu3 %v298_v3  ;;  %387 = vmatpush.msra.mxu1 %v291_v7  ;;  %v278_v11 = vld [vmem:[%s1112_s19 + $0x4] sm:$0x3]  ;;  %v279_v12 = vld [vmem:[%s1112_s19 + $0x6] sm:$0x3]  ;;  %v311_v14 = vld [vmem:[%s1120_s6 + $0xd8] sm:$0xff]  ;;  %s551_s28 = scalar_lea.sflag [#allocation4], %s1106_s25 }
  0x5b   : > { %412 = vmatpush.msra.mxu2 %v293_v4  ;;  %v290_v13 = vld [vmem:[%s1120_s6 + $0x30] sm:$0xff]  ;;  %v315_v15 = vld [vmem:[%s1120_s6 + $0xf8] sm:$0xff]  ;;  %365 = vmatpush.msra.mxu0 %v286_v10  ;;  %v285_v16 = vld [vmem:[%s1120_s6 + $0x8] sm:$0xff]  ;;  %s892_s7 = sshra.s32 %s566_s20, 4  ;;  %s898_s11 = scalar_lea.hbm %s1231_s3, 32  ;;  %s893_s7 = int_to_ptr.hbm [resolvable:$true] %s892_s7 }
  0x5c   : > { %435 = vmatpush.msra.mxu3 %v297_v5  ;;  %388 = vmatpush.msra.mxu1 %v290_v13  ;;  %v289_v17 = vld [vmem:[%s1120_s6 + $0x28] sm:$0xff]  ;;  %v310_v18 = vld [vmem:[%s1120_s6 + $0xd0] sm:$0xff]  ;;  %v284_v21 = vld [vmem:[%s1120_s6] sm:$0xff]  ;;  %s894_s21 = scalar_lea.hbm %s893_s7, 16  ;;  %p899_p3 = scmp.lt.s32.totalorder %s893_s7, %s1231_s3 }
  0x5d   : > { %413 = vmatpush.msra.mxu2 %v292_v8  ;;  %v314_v19 = vld [vmem:[%s1120_s6 + $0xf0] sm:$0xff]  ;;  %v309_v20 = vld [vmem:[%s1120_s6 + $0xc8] sm:$0xff]  ;;  %v288_v22 = vld [vmem:[%s1120_s6 + $0x20] sm:$0xff]  ;;  %366 = vmatpush.msra.mxu0 %v285_v16  ;;  %p895_p6 = scmp.ne.s32.totalorder %s893_s7, %s894_s21  ;;  %p900_p4 = scmp.lt.s32.totalorder %s898_s11, %s894_s21 }
  0x5e   : > { %436 = vmatpush.msra.mxu3 %v296_v9  ;;  %701 = vmatmul.msk.f32.vlgmr.msra.gmra.mxu2 %vm348_vm0, %v278_v11  ;;  %v313_v23 = vld [vmem:[%s1120_s6 + $0xe8] sm:$0xff]  ;;  %v276_v24 = vld [vmem:[%s1112_s19] sm:$0x3]  ;;  %v277_v25 = vld [vmem:[%s1112_s19 + $0x2] sm:$0x3] }
  0x5f   : > { %702 = vmatmul.msk.f32.vlgmr.msra.gmra.mxu3 %vm348_vm0, %v279_v12  ;;  %502 = vmatpush.msrb.mxu2 %v311_v14  ;;  %v303_v26 = vld [vmem:[%s1120_s6 + $0x98] sm:$0xff]  ;;  %v308_v28 = vld [vmem:[%s1120_s6 + $0xc0] sm:$0xff]  ;;  %v302_v30 = vld [vmem:[%s1120_s6 + $0x90] sm:$0xff]  ;;  %p896_p13 = pnand %p895_p6, %p1024_p11  ;;  %p901_p0 = por %p900_p4, %p899_p3 }
  0x60   : > { %525 = vmatpush.msrb.mxu3 %v315_v15  ;;  %389 = vmatpush.msra.mxu1 %v289_v17  ;;  %v307_v27 = vld [vmem:[%s1120_s6 + $0xb8] sm:$0xff]  ;;  %v312_v29 = vld [vmem:[%s1120_s6 + $0xe0] sm:$0xff]  ;;  %v306_v31 = vld [vmem:[%s1120_s6 + $0xb0] sm:$0xff] }
  0x61   : > { %503 = vmatpush.msrb.mxu2 %v310_v18  ;;  %367 = vmatpush.msra.mxu0 %v284_v21  ;;  %v282_v32 = vld [vmem:[%s1112_s19 + $0xc] sm:$0x3]  ;;  %v283_v33 = vld [vmem:[%s1112_s19 + $0xe] sm:$0x3]  ;;  %v300_v36 = vld [vmem:[%s1120_s6 + $0x80] sm:$0xff]  ;;  %p897_p2 = pneg %p896_p13 }
  0x62   : > { %526 = vmatpush.msrb.mxu3 %v314_v19  ;;  %390 = vmatpush.msra.mxu1 %v288_v22  ;;  %v301_v34 = vld [vmem:[%s1120_s6 + $0x88] sm:$0xff]  ;;  %v304_v37 = vld [vmem:[%s1120_s6 + $0xa0] sm:$0xff] }
  0x63   : > { %504 = vmatpush.msrb.mxu2 %v309_v20  ;;  %699 = vmatmul.msk.f32.vlgmr.msra.gmra.mxu0 %vm348_vm0, %v276_v24  ;;  %v305_v35 = vld [vmem:[%s1120_s6 + $0xa8] sm:$0xff]  ;;  %p902_p5 = pnand %p901_p0, %p897_p2 }
  0x64   : > { %527 = vmatpush.msrb.mxu3 %v313_v23  ;;  %700 = vmatmul.msk.f32.vlgmr.msra.gmra.mxu1 %vm348_vm0, %v277_v25  ;;  %v280_v38 = vld [vmem:[%s1112_s19 + $0x8] sm:$0x3]  ;;  %v281_v39 = vld [vmem:[%s1112_s19 + $0xa] sm:$0x3]  ;;  %v780_v40 = vld [vmem:[%s1163_s1] ss:$0 sm:$0xff] }
  0x65   : > { %456 = vmatpush.msrb.mxu0 %v303_v26  ;;  %479 = vmatpush.msrb.mxu1 %v307_v27  ;;  %v781_v41 = vld [vmem:[%s1163_s1 + $0x1] ss:$0 sm:$0xff]  ;;  %v782_v42 = vld [vmem:[%s1163_s1 + $0x2] ss:$0 sm:$0xff]  ;;  %v783_v43 = vld [vmem:[%s1163_s1 + $0x3] ss:$0 sm:$0xff] }
  0x66   : > { %505 = vmatpush.msrb.mxu2 %v308_v28  ;;  %528 = vmatpush.msrb.mxu3 %v312_v29  ;;  %v784_v56 = vld [vmem:[%s1163_s1 + $0x4] ss:$0 sm:$0xff]  ;;  %v785_v57 = vld [vmem:[%s1163_s1 + $0x5] ss:$0 sm:$0xff]  ;;  %v786_v58 = vld [vmem:[%s1163_s1 + $0x6] ss:$0 sm:$0xff] }
  0x67   : > { %457 = vmatpush.msrb.mxu0 %v302_v30  ;;  %480 = vmatpush.msrb.mxu1 %v306_v31  ;;  %v787_v59 = vld [vmem:[%s1163_s1 + $0x7] ss:$0 sm:$0xff] }
  0x68   : > { %705 = vmatmul.msk.f32.vlgmr.msrb.gmra.mxu2 %vm348_vm0, %v282_v32  ;;  %706 = vmatmul.msk.f32.vlgmr.msrb.gmra.mxu3 %vm348_vm0, %v283_v33 }
  0x69   : > { %458 = vmatpush.msrb.mxu0 %v301_v34  ;;  %481 = vmatpush.msrb.mxu1 %v305_v35 }
  0x6b   : > { %459 = vmatpush.msrb.mxu0 %v300_v36  ;;  %482 = vmatpush.msrb.mxu1 %v304_v37 }
  0x6c   : > { %703 = vmatmul.msk.f32.vlgmr.msrb.gmra.mxu0 %vm348_vm0, %v280_v38  ;;  %704 = vmatmul.msk.f32.vlgmr.msrb.gmra.mxu1 %vm348_vm0, %v281_v39 }
  0xe0   : > { %v369_v44 = vpop.f32.mrf.mxu0 }
  0xe1   : > { %v392_v45 = vpop.f32.mrf.mxu1  ;;  %v370_v46 = vadd.f32 %v780_v40, %v369_v44  ;;  %v415_v48 = vpop.f32.mrf.mxu2 }
  0xe2   : > { %v393_v47 = vadd.f32 %v781_v41, %v392_v45  ;;  %v438_v49 = vpop.f32.mrf.mxu3  ;;  %v416_v50 = vadd.f32 %v782_v42, %v415_v48 }
  0xe3   : > { %v439_v51 = vadd.f32 %v783_v43, %v438_v49  ;;  %v533_v52 = vadd.f32 0.1, %v370_v46 }
  0xe4   : > { %v534_v53 = vadd.f32 0.1, %v393_v47  ;;  %v535_v54 = vadd.f32 0.1, %v416_v50 }
  0xe5   : > { %v536_v55 = vadd.f32 0.1, %v439_v51  ;;  %542 = vst.msk [vmem:[%s271_s5] sm:$0x3] %vm541_vm1, %v533_v52 }
  0xe6   : > { %543 = vst.msk [vmem:[%s271_s5 + $0x2] sm:$0x3] %vm541_vm1, %v534_v53 }
  0xe7   : > { %544 = vst.msk [vmem:[%s271_s5 + $0x4] sm:$0x3] %vm541_vm1, %v535_v54 }
  0xe8   : > { %545 = vst.msk [vmem:[%s271_s5 + $0x6] sm:$0x3] %vm541_vm1, %v536_v55 }
  0xe9   : > { %v461_v60 = vpop.f32.mrf.mxu0  ;;  %v484_v61 = vpop.f32.mrf.mxu1 }
  0xea   : > { %v462_v62 = vadd.f32 %v784_v56, %v461_v60  ;;  %v485_v63 = vadd.f32 %v785_v57, %v484_v61 }
  0xeb   : > { %v507_v0 = vpop.f32.mrf.mxu2  ;;  %v530_v1 = vpop.f32.mrf.mxu3 }
  0xec   : > { %v537_v2 = vadd.f32 0.1, %v462_v62  ;;  %v538_v3 = vadd.f32 0.1, %v485_v63  ;;  %v508_v4 = vadd.f32 %v786_v58, %v507_v0  ;;  %v531_v5 = vadd.f32 %v787_v59, %v530_v1 }
  0xee   : > { %546 = vst.msk [vmem:[%s271_s5 + $0x8] sm:$0x3] %vm541_vm1, %v537_v2  ;;  %v539_v6 = vadd.f32 0.1, %v508_v4  ;;  %v540_v7 = vadd.f32 0.1, %v531_v5 }
  0xef   : > { %547 = vst.msk [vmem:[%s271_s5 + $0xa] sm:$0x3] %vm541_vm1, %v538_v3 }
  0xf0   : > { %548 = vst.msk [vmem:[%s271_s5 + $0xc] sm:$0x3] %vm541_vm1, %v539_v6 }
  0xf1   : > { %549 = vst.msk [vmem:[%s271_s5 + $0xe] sm:$0x3] %vm541_vm1, %v540_v7 }
  0xf2   : > { %905 = shalt.err (!%p902_p5)
}
  0xf3   : > { %s956_s25 = smov 32   ;;  %s957_s14 = smov 2  }
  0xf4   : > { %722 = dma.vmem_to_hbm [thread:$0]  (%p1024_p11), %s564_s16, 256, %s566_s20, %s551_s28, %s956_s25, %s956_s25, %s957_s14  }
  0xf5 PF: > { %s580_s26 = sand.u32 1, %s936_s12   ;;  %p735_p7 = pnand %p684_p9, %p1028_p12 }
  0xf6   : > { %s581_s9 = scalar_lea.sflag [#allocation4], %s580_s26 }
  0xf7   : > { %p736_p8 = pneg %p735_p7 }
  0xf9   : > { %931 = dma.done.wait (%p736_p8), %s581_s9, 256  }
  0xfa   : > { %933 = vsyncadd (%p736_p8), %s581_s9, 4294967040  ;;  %s1242_s6 = sld [smem:[#allocation12_spill]]  ;;  %p19_p10 = scmp.ge.s32.totalorder %s1003_s18, 4  }
  0xfb   : > { %s1243_s14 = sld [smem:[#allocation13_spill]]  ;;  %s1244_s12 = smov %s940_s13 }
  0xfc   : > { %s1246_s15 = smov %s1003_s18  ;;  %21 = sbr.rel (!%p19_p10) target bundleno = 9 (0x9), region = 101 }
 0x100   : > { %s1245_s13 = smov %s1242_s6 }
 0x101   :  { %587 = vsyncpa [#allocation3], 1 }
 0x102   :  { %589 = vsyncpa [#allocation3 + $0x1], 1 }
 0x103   :  { %590 = vsyncpa [#allocation6], 1 }
 0x104   :  { %592 = vsyncpa [#allocation6 + $0x1], 1 }
 0x105   :  { %593 = vsyncpa [#allocation4], 1 }
 0x106   :  { %595 = vsyncpa [#allocation4 + $0x1], 1 }

</bundles_post_ra>
